<compile_context>
chip_gen: v5e
topology: v5e:2x2
jax: 0.10.0
libtpu: 0.0.40
codegen_flags: <defaults>
</compile_context>

<pallas_src>
import jax
import jax.numpy as jnp
from jax.experimental import pallas as pl
from jax.experimental.pallas import tpu as pltpu

EPS = 1e-5


def _cdiv(a, b):
    return (a + b - 1) // b


def _vmem_budget():
    """Generation-aware scoped-VMEM budget (bytes): ~3/4 of physical per-core VMEM.

    v5e/v6e: 128 MiB -> 96 MiB; v7x: 64 MiB -> 48 MiB.  Falls back to the v7x-safe
    value if the hardware query is unavailable.
    """
    cap = None
    try:
        cap = getattr(pltpu.get_tpu_info(), "vmem_capacity_bytes", None)
    except Exception:
        cap = None
    if not cap or cap <= 0:
        cap = 64 << 20
    cap = min(int(cap), 128 << 20)
    return (3 * cap) // 4


def _choose_tile(nrows, ncols, elem_budget, row_unit):
    """Pick a (TR, TM) block for a (nrows, ncols) array.

    TM (lane axis) is the full extent or a multiple of 128; TR (sublane axis) is the
    full extent or a multiple of `row_unit`.  Blocks are sized purely by an element
    budget, so tile bytes are decoupled from the channel count.
    """
    tm_cap = max(128, (elem_budget // row_unit // 128) * 128)
    tm = ncols if ncols <= tm_cap else tm_cap
    tr_cap = max(row_unit, (elem_budget // tm // row_unit) * row_unit)
    tr = nrows if nrows <= tr_cap else tr_cap
    return tr, tm


def batch_norm(x, gamma, beta, eps=EPS, force_two_pass=False, _block_elems=None):
    """BatchNorm forward with training-mode (biased) batch statistics.

    x: (N, C, *spatial); gamma, beta: (C,).  Returns same shape/dtype as x.
    """
    n, c = x.shape[0], x.shape[1]
    hw = 1
    for s in x.shape[2:]:
        hw *= s
    nc = n * c
    m = n * hw

    vmem_limit = _vmem_budget()

    # ------------------------------------------------------------------
    # Fused single-read fast path: whole tensor resident in VMEM, stats +
    # apply in one kernel => 2x HBM traffic instead of 3x.  Uses the
    # numerically better centered variance since x is resident anyway.
    # ------------------------------------------------------------------
    x_bytes = x.dtype.itemsize * n * c * hw
    f32_bytes = 4 * n * c * hw
    if (not force_two_pass) and (2 * x_bytes + 3 * f32_bytes) <= vmem_limit:
        x3 = x.reshape(n, c, hw)                      # contiguous view, no data movement
        g3 = gamma.reshape(1, c, 1).astype(jnp.float32)
        b3 = beta.reshape(1, c, 1).astype(jnp.float32)
        inv_m = 1.0 / m

        def fused_kernel(x_ref, g_ref, b_ref, o_ref):
            xf = x_ref[...].astype(jnp.float32)                               # (N, C, HW)
            s = jnp.sum(jnp.sum(xf, axis=2, keepdims=True), axis=0, keepdims=True)
            mean = s * inv_m                                                  # (1, C, 1)
            xc = xf - mean
            var = jnp.sum(jnp.sum(xc * xc, axis=2, keepdims=True), axis=0,
                          keepdims=True) * inv_m
            scale = g_ref[...] * jax.lax.rsqrt(var + eps)
            o_ref[...] = (xc * scale + b_ref[...]).astype(o_ref.dtype)

        out3 = pl.pallas_call(
            fused_kernel,
            out_shape=jax.ShapeDtypeStruct((n, c, hw), x.dtype),
            compiler_params=pltpu.CompilerParams(vmem_limit_bytes=vmem_limit),
        )(x3, g3, b3)
        return out3.reshape(x.shape)

    # ------------------------------------------------------------------
    # Streaming two-pass path on a (N*C, HW) view.
    # ------------------------------------------------------------------
    x2 = x.reshape(nc, hw)                            # contiguous view, no data movement
    row_unit = max(8, 32 // max(1, x.dtype.itemsize))

    if _block_elems is None:
        # Byte-budgeted tiles: stats pass streams only x (2 live input buffers + f32
        # temps) so it gets ~2x the apply tile (2*in + 2*out + temps).
        stats_elems = max(row_unit * 128, vmem_limit // (6 * 4))
        apply_elems = max(row_unit * 128, vmem_limit // (12 * 4))
    else:
        stats_elems, apply_elems = _block_elems

    tr_s, tm_s = _choose_tile(nc, hw, stats_elems, row_unit)
    tr_a, tm_a = _choose_tile(nc, hw, apply_elems, row_unit)
    gi_s, gj_s = _cdiv(nc, tr_s), _cdiv(hw, tm_s)
    gi_a, gj_a = _cdiv(nc, tr_a), _cdiv(hw, tm_a)

    # ---- Pass 1: per-(row-block, lane-group) partial sums / sums of squares.
    # Every grid point owns its own output block -> both axes "parallel" (no carry,
    # v7x megacore friendly).  Ragged edge tiles are masked in-kernel (no jnp.pad).
    def stats_kernel(x_ref, sum_ref, sq_ref):
        xf = x_ref[...].astype(jnp.float32)                                   # (TR, TM)
        masks = []
        if nc % tr_s:
            row = jax.lax.broadcasted_iota(jnp.int32, xf.shape, 0)
            masks.append(row < (nc - pl.program_id(0) * tr_s))
        if hw % tm_s:
            col = jax.lax.broadcasted_iota(jnp.int32, xf.shape, 1)
            masks.append(col < (hw - pl.program_id(1) * tm_s))
        if masks:
            valid = masks[0] if len(masks) == 1 else masks[0] & masks[1]
            xf = jnp.where(valid, xf, 0.0)
        sum_ref[...] = jnp.sum(xf, axis=1, keepdims=True).reshape(sum_ref.shape)
        sq_ref[...] = jnp.sum(xf * xf, axis=1, keepdims=True).reshape(sq_ref.shape)

    psum, psq = pl.pallas_call(
        stats_kernel,
        out_shape=(
            jax.ShapeDtypeStruct((gi_s, gj_s, tr_s, 1), jnp.float32),
            jax.ShapeDtypeStruct((gi_s, gj_s, tr_s, 1), jnp.float32),
        ),
        grid=(gi_s, gj_s),
        in_specs=[pl.BlockSpec((tr_s, tm_s), lambda i, j: (i, j))],
        out_specs=(
            pl.BlockSpec((1, 1, tr_s, 1), lambda i, j: (i, j, 0, 0)),
            pl.BlockSpec((1, 1, tr_s, 1), lambda i, j: (i, j, 0, 0)),
        ),
        compiler_params=pltpu.CompilerParams(
            dimension_semantics=("parallel", "parallel"),
            vmem_limit_bytes=vmem_limit,
        ),
    )(x2)

    # ---- Tiny (C-sized) math in plain JAX: fold stats into per-row scale/shift.
    # NOTE: E[x^2] - mean^2 with f32 accumulators (the fused path uses centered form).
    inv_m = jnp.float32(1.0 / m)
    row_sum = jnp.sum(psum, axis=1).reshape(gi_s * tr_s)[:nc]
    row_sq = jnp.sum(psq, axis=1).reshape(gi_s * tr_s)[:nc]
    ch_sum = row_sum.reshape(n, c).sum(axis=0)                                # (C,)
    ch_sq = row_sq.reshape(n, c).sum(axis=0)                                  # (C,)
    mean = ch_sum * inv_m
    var = jnp.maximum(ch_sq * inv_m - mean * mean, 0.0)
    scale = gamma.astype(jnp.float32) * jax.lax.rsqrt(var + eps)              # (C,)
    shift = beta.astype(jnp.float32) - mean * scale                           # (C,)
    scale_rows = jnp.broadcast_to(scale[None, :], (n, c)).reshape(nc, 1)
    shift_rows = jnp.broadcast_to(shift[None, :], (n, c)).reshape(nc, 1)

    # ---- Pass 2: y = x * scale_row + shift_row.  Lane-dense blocks, fully parallel
    # grid; ragged edge tiles rely on dropped out-of-bounds stores.
    def apply_kernel(x_ref, sc_ref, sh_ref, o_ref):
        xf = x_ref[...].astype(jnp.float32)
        o_ref[...] = (xf * sc_ref[...] + sh_ref[...]).astype(o_ref.dtype)

    out2 = pl.pallas_call(
        apply_kernel,
        out_shape=jax.ShapeDtypeStruct((nc, hw), x.dtype),
        grid=(gi_a, gj_a),
        in_specs=[
            pl.BlockSpec((tr_a, tm_a), lambda i, j: (i, j)),
            pl.BlockSpec((tr_a, 1), lambda i, j: (i, 0)),
            pl.BlockSpec((tr_a, 1), lambda i, j: (i, 0)),
        ],
        out_specs=pl.BlockSpec((tr_a, tm_a), lambda i, j: (i, j)),
        compiler_params=pltpu.CompilerParams(
            dimension_semantics=("parallel", "parallel"),
            vmem_limit_bytes=vmem_limit,
        ),
    )(x2, scale_rows, shift_rows)

    return out2.reshape(x.shape)


def _reference(x, gamma, beta, eps=EPS):
    xf = x.astype(jnp.float32)
    axes = (0,) + tuple(range(2, x.ndim))
    mean = jnp.mean(xf, axis=axes, keepdims=True)
    var = jnp.mean((xf - mean) ** 2, axis=axes, keepdims=True)
    shape = (1, x.shape[1]) + (1,) * (x.ndim - 2)
    g = gamma.reshape(shape).astype(jnp.float32)
    b = beta.reshape(shape).astype(jnp.float32)
    return ((xf - mean) * jax.lax.rsqrt(var + eps) * g + b).astype(x.dtype)


if __name__ == "__main__":
    key = jax.random.PRNGKey(0)
    k1, k2, k3, k4 = jax.random.split(key, 4)

    # Case 1: nn.BatchNorm2d-style input -> fused single-read path.
    N, C, H, W = 2, 4, 16, 16
    x = jax.random.normal(k1, (N, C, H, W), dtype=jnp.float32) * 2.0 + 0.5
    gamma = jnp.ones((C,), dtype=jnp.float32)     # nn.BatchNorm default affine init
    beta = jnp.zeros((C,), dtype=jnp.float32)

    out = jax.block_until_ready(batch_norm(x, gamma, beta))
    ref = _reference(x, gamma, beta)
    assert out.shape == x.shape and out.dtype == x.dtype
    assert jnp.allclose(out, ref, atol=1e-4, rtol=1e-4)

    # Case 2: same input through the streaming two-pass path.
    out2 = jax.block_until_ready(batch_norm(x, gamma, beta, force_two_pass=True))
    assert jnp.allclose(out2, ref, atol=1e-4, rtol=1e-4)

    # Case 3: two-pass path with ragged edge tiles (rows not a multiple of 8, lanes not
    # a multiple of 128) exercised via a small forced block budget.
    N2, C2, H2, W2 = 2, 5, 10, 30
    x_r = jax.random.normal(k2, (N2, C2, H2, W2), dtype=jnp.float32) * 1.5 - 0.3
    gamma_r = jax.random.normal(k3, (C2,), dtype=jnp.float32) * 0.1 + 1.0
    beta_r = jax.random.normal(k4, (C2,), dtype=jnp.float32) * 0.1
    out_r = jax.block_until_ready(
        batch_norm(x_r, gamma_r, beta_r, force_two_pass=True, _block_elems=(1024, 1024)))
    ref_r = _reference(x_r, gamma_r, beta_r)
    assert out_r.shape == x_r.shape and out_r.dtype == x_r.dtype
    assert jnp.allclose(out_r, ref_r, atol=1e-4, rtol=1e-4)

    print("KERNEL_OK")
</pallas_src>

<mosaic_0001>
module attributes {stable_mosaic.version = 11 : i64} {
  func.func @fused_kernel(%arg0: memref<2x4x256xf32, #tpu.memory_space<vmem>>, %arg1: memref<1x4x1xf32, #tpu.memory_space<vmem>>, %arg2: memref<1x4x1xf32, #tpu.memory_space<vmem>>, %arg3: memref<2x4x256xf32, #tpu.memory_space<vmem>>) attributes {dimension_semantics = [], scalar_prefetch = 0 : i64, scratch_operands = 0 : i64, tpu.core_type = #tpu.core_type<tc>} {
    %c0 = arith.constant 0 : index
    %c0_0 = arith.constant 0 : index
    %c0_1 = arith.constant 0 : index
    %0 = vector.load %arg0[%c0, %c0_0, %c0_1] : memref<2x4x256xf32, #tpu.memory_space<vmem>>, vector<2x4x256xf32>
    %cst = arith.constant dense<0.000000e+00> : vector<2x4xf32>
    %1 = vector.multi_reduction <add>, %0, %cst [2] : vector<2x4x256xf32> to vector<2x4xf32>
    %2 = vector.shape_cast %1 : vector<2x4xf32> to vector<2x4x1xf32>
    %cst_2 = arith.constant dense<0.000000e+00> : vector<4x1xf32>
    %3 = vector.multi_reduction <add>, %2, %cst_2 [0] : vector<2x4x1xf32> to vector<4x1xf32>
    %4 = vector.shape_cast %3 : vector<4x1xf32> to vector<1x4x1xf32>
    %cst_3 = arith.constant 0.001953125 : f32
    %5 = vector.broadcast %cst_3 : f32 to vector<1x4x1xf32>
    %6 = arith.mulf %4, %5 : vector<1x4x1xf32>
    %7 = vector.broadcast %6 : vector<1x4x1xf32> to vector<2x4x256xf32>
    %8 = arith.subf %0, %7 : vector<2x4x256xf32>
    %9 = arith.mulf %8, %8 : vector<2x4x256xf32>
    %cst_4 = arith.constant dense<0.000000e+00> : vector<2x4xf32>
    %10 = vector.multi_reduction <add>, %9, %cst_4 [2] : vector<2x4x256xf32> to vector<2x4xf32>
    %11 = vector.shape_cast %10 : vector<2x4xf32> to vector<2x4x1xf32>
    %cst_5 = arith.constant dense<0.000000e+00> : vector<4x1xf32>
    %12 = vector.multi_reduction <add>, %11, %cst_5 [0] : vector<2x4x1xf32> to vector<4x1xf32>
    %13 = vector.shape_cast %12 : vector<4x1xf32> to vector<1x4x1xf32>
    %cst_6 = arith.constant 0.001953125 : f32
    %14 = vector.broadcast %cst_6 : f32 to vector<1x4x1xf32>
    %15 = arith.mulf %13, %14 : vector<1x4x1xf32>
    %c0_7 = arith.constant 0 : index
    %c0_8 = arith.constant 0 : index
    %c0_9 = arith.constant 0 : index
    %16 = vector.load %arg1[%c0_7, %c0_8, %c0_9] : memref<1x4x1xf32, #tpu.memory_space<vmem>>, vector<1x4x1xf32>
    %cst_10 = arith.constant 9.99999974E-6 : f32
    %17 = vector.broadcast %cst_10 : f32 to vector<1x4x1xf32>
    %18 = arith.addf %15, %17 : vector<1x4x1xf32>
    %19 = math.rsqrt %18 : vector<1x4x1xf32>
    %20 = arith.mulf %16, %19 : vector<1x4x1xf32>
    %21 = vector.broadcast %20 : vector<1x4x1xf32> to vector<2x4x256xf32>
    %22 = arith.mulf %8, %21 : vector<2x4x256xf32>
    %c0_11 = arith.constant 0 : index
    %c0_12 = arith.constant 0 : index
    %c0_13 = arith.constant 0 : index
    %23 = vector.load %arg2[%c0_11, %c0_12, %c0_13] : memref<1x4x1xf32, #tpu.memory_space<vmem>>, vector<1x4x1xf32>
    %24 = vector.broadcast %23 : vector<1x4x1xf32> to vector<2x4x256xf32>
    %25 = arith.addf %22, %24 : vector<2x4x256xf32>
    %c0_14 = arith.constant 0 : index
    %c0_15 = arith.constant 0 : index
    %c0_16 = arith.constant 0 : index
    %26 = vector.load %arg3[%c0_14, %c0_15, %c0_16] : memref<2x4x256xf32, #tpu.memory_space<vmem>>, vector<2x4x256xf32>
    tpu.vector_store %arg3[%c0_14, %c0_15, %c0_16], %25 {strides = array<i32>} : memref<2x4x256xf32, #tpu.memory_space<vmem>>, vector<2x4x256xf32>,
    return
  }
}

</mosaic_0001>

<bundles_post_ra>
// kernel: tpu_custom_call.1
= control target key start
LH: loop header
LB: loop body
LE: loop exit
PB: predicated region body
PF: predicated region fallthrough
CT: control target
= control target key end

     0   :  { %8 = vsyncpa [#allocation3], 0  ;;  %s273_s0 = inlined_call_operand.hbm [shape: f32[2,4,256], index: 0, kind: input, shape index: {}]   ;;  %s274_s1 = inlined_call_operand.vmem [shape: f32[1,4,1], index: 1, kind: input, shape index: {}]   ;;  %s275_s2 = inlined_call_operand.vmem [shape: f32[1,4,1], index: 2, kind: input, shape index: {}]   ;;  %s276_s3 = inlined_call_operand.hbm [shape: f32[2,4,256], index: 3, kind: output, shape index: {}]  }
   0x1   :  { %9 = vsyncpa [#allocation4], 0  ;;  %s14_s14 = sshll.u32 %s273_s0, 4  ;;  %s217_s15 = smov [#allocation2]   ;;  %s15_s14 = int_to_ptr.hbm [resolvable:$true] %s14_s14 }
   0x2   :  { %s16_s16 = sshll.u32 %s217_s15, 4  ;;  %s218_s17 = smov 128   ;;  %s17_s16 = int_to_ptr.vmem [resolvable:$true] %s16_s16 }
   0x3   :  { %s219_s18 = smov 8  }
   0x4   :  { %22 = dma.hbm_to_vmem [thread:$0]  %s15_s14, 256, %s17_s16, [#allocation3], %s218_s17, %s218_s17, %s219_s18  }
   0x5   :  { %213 = dma.done.wait [#allocation3], 256  }
   0x6   :  { %214 = vsyncadd [#allocation3], 4294967040  ;;  %v31_v0 = vld [vmem:[#allocation2] sm:$0xff]  ;;  %v32_v1 = vld [vmem:[#allocation2 + $0x8] sm:$0xff]  ;;  %vm46_vm0 = vcmask 1043456   ;;  %v221_v36 = vmov 0  }
   0x7   :  { %35 = vst [vmem:[#allocation1] ss:$2 sm:$0xff] %v31_v0  ;;  %v220_v13 = vmov 839922192   ;;  %161 = vset.pattern.permute.xlu2 %v221_v36  ;;  %162 = vset.pattern.permute.xlu0 %v221_v36  ;;  %v98_v49 = vld [vmem:[%s274_s1] sm:$0xf] }
   0x8   :  { %39 = vst [vmem:[#allocation1 + $0x10] ss:$2 sm:$0xff] %v32_v1  ;;  %v63_v14 = vunpack.c.l.s4 %v220_v13  ;;  %v122_v53 = vld [vmem:[%s275_s2] sm:$0xf]  ;;  %s222_s22 = smov [#allocation5]   ;;  %s142_s25 = sshll.u32 %s276_s3, 4  ;;  %s143_s25 = int_to_ptr.hbm [resolvable:$true] %s142_s25 }
   0x9   :  { %s140_s23 = sshll.u32 %s222_s22, 4  ;;  %s141_s23 = int_to_ptr.vmem [resolvable:$true] %s140_s23 }
   0xa   :  { %v64_v18 = vunpack.c.0.s8 %v63_v14 }
   0xe   :  { %v36_v2 = vld.sshfl [vmem:[#allocation1] sm:$0xff pattern:$0x75316420]  ;;  %v37_v3 = vld.sshfl [vmem:[#allocation1 + $0x8] sm:$0xff pattern:$0x75316420] }
   0xf   :  { %v47_v4 = vsel %vm46_vm0, %v36_v2, 0.0  ;;  %v48_v5 = vsel %vm46_vm0, %v37_v3, 0.0  ;;  %v40_v7 = vld.sshfl [vmem:[#allocation1 + $0x10] sm:$0xff pattern:$0x75316420] }
  0x10   :  { %v49_v6 = vadd.f32 %v48_v5, %v47_v4  ;;  %v41_v8 = vld.sshfl [vmem:[#allocation1 + $0x18] sm:$0xff pattern:$0x75316420]  ;;  %v52_v9 = vsel %vm46_vm0, %v40_v7, 0.0 }
  0x11   :  { %v53_v10 = vsel %vm46_vm0, %v41_v8, 0.0 }
  0x12   :  { %50 = vadd.xlane.f32.xlu0 %v49_v6  ;;  %v54_v11 = vadd.f32 %v53_v10, %v52_v9 }
  0x1a   :  { %55 = vadd.xlane.f32.xlu0 %v54_v11 }
  0x85   :  { %v51_v12 = vpop.xlane.xlu0 %50 }
  0x86   :  { %v57_v16 = vsel %vm46_vm0, %v51_v12, 0.0 }
  0x8d   :  { %v56_v15 = vpop.xlane.xlu0 %55 }
  0x8e   :  { %v58_v17 = vsel %vm46_vm0, %v56_v15, 0.0 }
  0x8f   :  { %v59_v19 = vadd.f32 %v58_v17, %v57_v16 }
  0x91   :  { %v60_v20 = vmul.f32 0.001953125, %v59_v19 }
  0x93   :  { %v65_v21 = vperm.slane %v60_v20, %v64_v18 }
  0x95   :  { %v67_v22 = vsub.f32 %v31_v0, %v65_v21  ;;  %v68_v23 = vsub.f32 %v32_v1, %v65_v21 }
  0x97   :  { %v69_v24 = vmul.f32 %v67_v22, %v67_v22  ;;  %v70_v25 = vmul.f32 %v68_v23, %v68_v23 }
  0x99   :  { %73 = vst [vmem:[#allocation1] ss:$2 sm:$0xff] %v69_v24 }
  0x9a   :  { %77 = vst [vmem:[#allocation1 + $0x10] ss:$2 sm:$0xff] %v70_v25 }
  0xa0   :  { %v74_v26 = vld.sshfl [vmem:[#allocation1] sm:$0xff pattern:$0x75316420]  ;;  %v75_v27 = vld.sshfl [vmem:[#allocation1 + $0x8] sm:$0xff pattern:$0x75316420] }
  0xa1   :  { %v84_v28 = vsel %vm46_vm0, %v74_v26, 0.0  ;;  %v85_v29 = vsel %vm46_vm0, %v75_v27, 0.0  ;;  %v78_v31 = vld.sshfl [vmem:[#allocation1 + $0x10] sm:$0xff pattern:$0x75316420] }
  0xa2   :  { %v86_v30 = vadd.f32 %v85_v29, %v84_v28  ;;  %v79_v32 = vld.sshfl [vmem:[#allocation1 + $0x18] sm:$0xff pattern:$0x75316420]  ;;  %v89_v33 = vsel %vm46_vm0, %v78_v31, 0.0 }
  0xa3   :  { %v90_v34 = vsel %vm46_vm0, %v79_v32, 0.0 }
  0xa4   :  { %87 = vadd.xlane.f32.xlu1 %v86_v30  ;;  %v91_v35 = vadd.f32 %v90_v34, %v89_v33 }
  0xac   :  { %92 = vadd.xlane.f32.xlu1 %v91_v35 }
 0x117   :  { %v88_v37 = vpop.xlane.xlu1 %87 }
 0x118   :  { %v94_v39 = vsel %vm46_vm0, %v88_v37, 0.0 }
 0x11f   :  { %v93_v38 = vpop.xlane.xlu1 %92 }
 0x120   :  { %v95_v40 = vsel %vm46_vm0, %v93_v38, 0.0 }
 0x121   :  { %v96_v41 = vadd.f32 %v95_v40, %v94_v39 }
 0x123   :  { %v97_v42 = vmul.f32 0.001953125, %v96_v41 }
 0x125   :  { %v99_v43 = vadd.f32 1e-05, %v97_v42 }
 0x127   :  { %163 = vrsqrt.f32 %v99_v43  ;;  %vm106_vm2 = vweird.f32 %v99_v43 }
 0x12d   :  { %v164_v44 = vpop.eup %163 }
 0x12e   :  { %v101_v45 = vmul.f32 %v164_v44, %v99_v43  ;;  %vm107_vm1 = vweird.f32 %v164_v44 }
 0x12f   :  { %vm108_vm3 = vmor %vm106_vm2, %vm107_vm1 }
 0x130   :  { %v102_v46 = vmul.f32 %v164_v44, %v101_v45 }
 0x132   :  { %v103_v47 = vmul.f32 0.5, %v102_v46 }
 0x134   :  { %v104_v48 = vsub.f32 1.5, %v103_v47 }
 0x136   :  { %v105_v50 = vmul.f32 %v164_v44, %v104_v48 }
 0x138   :  { %v109_v51 = vsel %vm108_vm3, %v164_v44, %v105_v50 }
 0x139   :  { %v110_v52 = vmul.f32 %v109_v51, %v98_v49 }
 0x13b   :  { %113 = vperm.xlu2 %161, %v110_v52  }
 0x143   :  { %125 = vperm.xlu2 %161, %v122_v53  }
 0x195   :  { %v114_v54 = vpop.permute.xlu2 %113 }
 0x196   :  { %v118_v55 = vperm.slane %v114_v54, %v64_v18 }
 0x198   :  { %v120_v57 = vmul.f32 %v118_v55, %v67_v22  ;;  %v121_v58 = vmul.f32 %v118_v55, %v68_v23 }
 0x19d   :  { %v126_v56 = vpop.permute.xlu2 %125 }
 0x19e   :  { %v130_v59 = vperm.slane %v126_v56, %v64_v18 }
 0x1a0   :  { %v132_v60 = vadd.f32 %v130_v59, %v120_v57  ;;  %v133_v61 = vadd.f32 %v130_v59, %v121_v58 }
 0x1a2   :  { %134 = vst [vmem:[#allocation5] sm:$0xff] %v132_v60 }
 0x1a3   :  { %135 = vst [vmem:[#allocation5 + $0x8] sm:$0xff] %v133_v61 }
 0x1a4   :  { %148 = dma.vmem_to_hbm [thread:$0]  %s141_s23, 256, %s143_s25, [#allocation4], %s218_s17, %s218_s17, %s219_s18  }
 0x1a5   :  { %215 = dma.done.wait [#allocation4], 256  }
 0x1a6   :  { %216 = vsyncadd [#allocation4], 4294967040 }
 0x1a7   :  { %153 = vsyncpa [#allocation3], 1 }
 0x1a8   :  { %154 = vsyncpa [#allocation4], 1 }

</bundles_post_ra>
